<compile_context>
chip_gen: v7x
topology: tpu7x:2x2x1
jax: 0.10.0
libtpu: 0.0.40
codegen_flags: <defaults>
</compile_context>

<pallas_src>
import functools

import jax
import jax.numpy as jnp
from jax.experimental import pallas as pl
from jax.experimental.pallas import tpu as pltpu

LANE = 128


# ---------------------------------------------------------------------------
# Math shared by the kernel, the ragged-tail path and the small-input fallback
# ---------------------------------------------------------------------------
def _envelope_math(x, p, a, b, c):
    """x is float32.  Horner form: 1/x + x^(p-1) * (a + x*(b + c*x))."""
    poly = x ** (p - 1) * (a + x * (b + c * x))
    env = 1.0 / x + poly
    # Same select semantics as torch.where(inputs < 1, env, 0): NaN -> 0.
    return jnp.where(x < 1.0, env, jnp.zeros_like(x))


def _envelope_jax(x, p, a, b, c):
    xf = x.astype(jnp.float32)
    return _envelope_math(xf, p, a, b, c).astype(x.dtype)


# ---------------------------------------------------------------------------
# Pallas kernel
# ---------------------------------------------------------------------------
def _envelope_kernel(x_ref, o_ref, *, p, a, b, c):
    # Upcast once to f32 (no-op for f32 inputs, tightens bf16 accuracy; the
    # kernel is HBM-bound so the cast is free).
    x = x_ref[...].astype(jnp.float32)
    o_ref[...] = _envelope_math(x, p, a, b, c).astype(o_ref.dtype)


def _sublane_multiple(dtype) -> int:
    itemsize = jnp.dtype(dtype).itemsize
    return max(8, 32 // max(1, itemsize))  # 8 for f32, 16 for bf16, 32 for 8-bit


def _dimension_semantics():
    """Core-parallel on v7x (2 TCs/chip); plain parallel otherwise."""
    try:
        kind = jax.devices()[0].device_kind.lower()
    except Exception:
        kind = ""
    if ("v7" in kind) or ("7x" in kind):
        return (getattr(pltpu, "CORE_PARALLEL", "parallel"),)
    return ("parallel",)


def _vmem_capacity_bytes() -> int:
    try:
        return int(pltpu.get_tpu_info().vmem_capacity_bytes)
    except Exception:
        return 64 * 1024 * 1024  # conservative (v7x-sized) fallback


def _envelope_pallas_2d(x2d, p, a, b, c, tile_rows):
    rows, _ = x2d.shape
    dtype = x2d.dtype
    itemsize = jnp.dtype(dtype).itemsize
    mult = _sublane_multiple(dtype)

    # Budget double-buffered in+out (4 * tr * LANE * itemsize) at <= VMEM/2.
    vmem_budget = _vmem_capacity_bytes() // 2
    max_tr = max(mult, (vmem_budget // (4 * LANE * itemsize)) // mult * mult)

    tr = min(tile_rows, max_tr)
    tr = max(mult, (tr // mult) * mult)
    if rows <= tr:
        tr = rows  # single block == full array dims: always a legal BlockSpec
    grid = (pl.cdiv(rows, tr),)

    vmem_limit = min(
        vmem_budget,
        max(8 * 1024 * 1024, 4 * tr * LANE * itemsize + 2 * 1024 * 1024),
    )

    kernel = functools.partial(_envelope_kernel, p=p, a=a, b=b, c=c)

    return pl.pallas_call(
        kernel,
        out_shape=jax.ShapeDtypeStruct((rows, LANE), dtype),
        grid_spec=pltpu.PrefetchScalarGridSpec(
            num_scalar_prefetch=0,
            grid=grid,
            in_specs=[pl.BlockSpec((tr, LANE), lambda i: (i, 0))],
            out_specs=pl.BlockSpec((tr, LANE), lambda i: (i, 0)),
        ),
        compiler_params=pltpu.CompilerParams(
            dimension_semantics=_dimension_semantics(),
            vmem_limit_bytes=vmem_limit,
        ),
    )(x2d)


# ---------------------------------------------------------------------------
# Public wrapper (matches the PyTorch Envelope.forward)
# ---------------------------------------------------------------------------
def envelope(inputs, exponent: int, *, tile_rows: int = 4096,
             small_input_threshold: int = 262_144):
    """Applies the Envelope cutoff elementwise. Matches the PyTorch module."""
    p = exponent + 1
    a = -(p + 1) * (p + 2) / 2.0
    b = float(p * (p + 2))
    c = -p * (p + 1) / 2.0

    orig_shape = inputs.shape
    n = inputs.size

    if n == 0:
        return inputs
    # Tiny inputs: pallas_call launch + pipeline fill dominates; let XLA fuse.
    if n < small_input_threshold:
        return _envelope_jax(inputs, p, a, b, c)

    flat = inputs.reshape(-1)
    rows = n // LANE
    rem = n - rows * LANE

    if rows == 0:
        return _envelope_jax(inputs, p, a, b, c)

    if rem == 0:
        # Common case: zero extra HBM passes (direct lane-dense reshape).
        out2d = _envelope_pallas_2d(flat.reshape(rows, LANE), p, a, b, c, tile_rows)
        return out2d.reshape(orig_shape)

    # Ragged size: kernel on the 128-aligned prefix, plain JAX on the tail.
    prefix = flat[: rows * LANE].reshape(rows, LANE)
    out_prefix = _envelope_pallas_2d(prefix, p, a, b, c, tile_rows)
    tail_out = _envelope_jax(flat[rows * LANE:], p, a, b, c)
    # TODO(synk): the concat is one extra pass over the prefix; the real fix is
    # fusing the envelope into its producer/consumer kernel.
    out_flat = jnp.concatenate([out_prefix.reshape(-1), tail_out])
    return out_flat.reshape(orig_shape)


def envelope_ref(inputs, exponent: int):
    """Pure-JAX reference mirroring the PyTorch forward exactly."""
    p = exponent + 1
    a = -(p + 1) * (p + 2) / 2.0
    b = float(p * (p + 2))
    c = -p * (p + 1) / 2.0
    env = 1.0 / inputs + a * inputs ** (p - 1) + b * inputs ** p + c * inputs ** (p + 1)
    return jnp.where(inputs < 1.0, env, jnp.zeros_like(inputs))


if __name__ == "__main__":
    key = jax.random.PRNGKey(0)
    exponent = 5  # module's __init__ arg

    k1, k2 = jax.random.split(key)
    # Lane-aligned case (2*4*16*16 = 2048 elements): pure streaming path.
    x1 = jax.random.uniform(k1, (2, 4, 16, 16), dtype=jnp.float32,
                            minval=0.05, maxval=1.5)
    # Ragged case (7*13*5 = 455 elements): aligned-prefix kernel + JAX tail.
    x2 = jax.random.uniform(k2, (7, 13, 5), dtype=jnp.float32,
                            minval=0.05, maxval=1.5)

    # small_input_threshold=0 forces the Pallas path for these small demos.
    out1 = jax.block_until_ready(envelope(x1, exponent, small_input_threshold=0))
    out2 = jax.block_until_ready(envelope(x2, exponent, small_input_threshold=0))

    ref1 = envelope_ref(x1, exponent)
    ref2 = envelope_ref(x2, exponent)

    assert out1.shape == x1.shape and out1.dtype == x1.dtype
    assert out2.shape == x2.shape and out2.dtype == x2.dtype
    assert jnp.allclose(out1, ref1, atol=1e-5, rtol=1e-5), "aligned-case mismatch"
    assert jnp.allclose(out2, ref2, atol=1e-5, rtol=1e-5), "ragged-case mismatch"

    print("KERNEL_OK")
</pallas_src>

<mosaic_0001>
module attributes {stable_mosaic.version = 11 : i64} {
  func.func @_envelope_kernel(%arg0: i32, %arg1: memref<16x128xf32, #tpu.memory_space<vmem>>, %arg2: memref<16x128xf32, #tpu.memory_space<vmem>>) attributes {dimension_semantics = [#tpu.dimension_semantics<parallel>], iteration_bounds = array<i64: 1>, scalar_prefetch = 0 : i64, scratch_operands = 0 : i64, tpu.core_type = #tpu.core_type<tc>, window_params = [{transform_indices = @transform_0, window_bounds = array<i64: 16, 128>}, {transform_indices = @transform_1, window_bounds = array<i64: 16, 128>}]} {
    %c0 = arith.constant 0 : index
    %c0_0 = arith.constant 0 : index
    %0 = vector.load %arg1[%c0, %c0_0] : memref<16x128xf32, #tpu.memory_space<vmem>>, vector<16x128xf32>
    %1 = arith.mulf %0, %0 : vector<16x128xf32>
    %2 = arith.mulf %1, %1 : vector<16x128xf32>
    %3 = arith.mulf %0, %2 : vector<16x128xf32>
    %cst = arith.constant -2.100000e+01 : f32
    %4 = vector.broadcast %cst : f32 to vector<16x128xf32>
    %5 = arith.mulf %4, %0 : vector<16x128xf32>
    %cst_1 = arith.constant 4.800000e+01 : f32
    %6 = vector.broadcast %cst_1 : f32 to vector<16x128xf32>
    %7 = arith.addf %6, %5 : vector<16x128xf32>
    %8 = arith.mulf %0, %7 : vector<16x128xf32>
    %cst_2 = arith.constant -2.800000e+01 : f32
    %9 = vector.broadcast %cst_2 : f32 to vector<16x128xf32>
    %10 = arith.addf %9, %8 : vector<16x128xf32>
    %11 = arith.mulf %3, %10 : vector<16x128xf32>
    %cst_3 = arith.constant 1.000000e+00 : f32
    %12 = vector.broadcast %cst_3 : f32 to vector<16x128xf32>
    %13 = arith.divf %12, %0 : vector<16x128xf32>
    %14 = arith.addf %13, %11 : vector<16x128xf32>
    %cst_4 = arith.constant 1.000000e+00 : f32
    %15 = vector.broadcast %cst_4 : f32 to vector<16x128xf32>
    %16 = arith.cmpf olt, %0, %15 : vector<16x128xf32>
    %cst_5 = arith.constant 0.000000e+00 : f32
    %17 = vector.broadcast %cst_5 : f32 to vector<16x128xf32>
    %18 = arith.select %16, %14, %17 : vector<16x128xi1>, vector<16x128xf32>
    %c0_6 = arith.constant 0 : index
    %c0_7 = arith.constant 0 : index
    %19 = vector.load %arg2[%c0_6, %c0_7] : memref<16x128xf32, #tpu.memory_space<vmem>>, vector<16x128xf32>
    tpu.vector_store %arg2[%c0_6, %c0_7], %18 {strides = array<i32>} : memref<16x128xf32, #tpu.memory_space<vmem>>, vector<16x128xf32>,
    return
  }
  func.func @transform_0(%arg0: i32) -> (i32, i32) {
    %c0_i32 = arith.constant 0 : i32
    %c0_i32_0 = arith.constant 0 : i32
    return %arg0, %c0_i32 : i32, i32
  }
  func.func @transform_1(%arg0: i32) -> (i32, i32) {
    %c0_i32 = arith.constant 0 : i32
    %c0_i32_0 = arith.constant 0 : i32
    return %arg0, %c0_i32 : i32, i32
  }
}

</mosaic_0001>

<bundles_post_ra>
// kernel: tpu_custom_call.1
= control target key start
LH: loop header
LB: loop body
LE: loop exit
PB: predicated region body
PF: predicated region fallthrough
CT: control target
= control target key end

     0   :  { %6 = vsyncpa [#allocation3], 0  ;;  %s170_s0 = inlined_call_operand.hbm [shape: f32[16,128], index: 0, kind: input, shape index: {}]   ;;  %s171_s1 = inlined_call_operand.hbm [shape: f32[16,128], index: 1, kind: output, shape index: {}]  }
   0x1   :  { %7 = vsyncpa [#allocation4], 0  ;;  %s126_s6 = smov [#allocation2]   ;;  %s78_s10 = scalar_lea.hbm %s170_s0, 256 }
   0x2   :  { %s13_s7 = sshll.u32 %s126_s6, 4  ;;  %p79_p0 = scmp.ne.s32.totalorder %s170_s0, %s78_s10  ;;  %s14_s7 = int_to_ptr.vmem [resolvable:$true] %s13_s7 }
   0x3   :  { %p82_p1 = scmp.lt.u32.totalorder %s78_s10, %s170_s0 }
   0x5   :  { %p84_p2 = pnand %p82_p1, %p79_p0 }
   0x7   :  { %87 = shalt.err (!%p84_p2)
}
   0x8   :  { %s88_s15 = scalar_lea.vmem %s14_s7, 256  ;;  %p93_p4 = scmp.lt.s32.totalorder %s14_s7, %s14_s7 }
   0x9   :  { %p89_p3 = scmp.ne.s32.totalorder %s14_s7, %s88_s15  ;;  %p94_p5 = scmp.lt.s32.totalorder %s88_s15, %s88_s15 }
   0xb   :  { %p95_p6 = por %p94_p5, %p93_p4 }
   0xd   :  { %p96_p7 = pnand %p95_p6, %p89_p3 }
   0xf   :  { %99 = shalt.err (!%p96_p7)
}
  0x10   :  { %s127_s16 = smov 128   ;;  %s128_s17 = smov 8  }
  0x11   :  { %19 = dma.hbm_to_vmem [thread:$0]  %s170_s0, 256, %s14_s7, [#allocation3], %s127_s16, %s127_s16, %s128_s17  }
  0x12   :  { %122 = dma.done.wait [#allocation3], 256  }
  0x13   :  { %123 = vsyncadd [#allocation3], 4294967040  ;;  %v23_v0 = vld [vmem:[#allocation2] sm:$0xff]  ;;  %v24_v1 = vld [vmem:[#allocation2 + $0x8] sm:$0xff]  ;;  %s129_s0 = smov [#allocation5]  }
  0x14   :  { %v25_v2 = vmul.f32 %v23_v0, %v23_v0  ;;  %v31_v3 = vmul.f32 -21.0, %v23_v0  ;;  %74 = vrcp.f32 %v23_v0  ;;  %v26_v4 = vmul.f32 %v24_v1, %v24_v1  ;;  %s58_s20 = sshll.u32 %s129_s0, 4  ;;  %s59_s20 = int_to_ptr.vmem [resolvable:$true] %s58_s20 }
  0x15   :  { %v32_v5 = vmul.f32 -21.0, %v24_v1  ;;  %76 = vrcp.f32 %v24_v1  ;;  %vm47_vm0 = vcmp.lt.f32.partialorder %v23_v0, 1.0  ;;  %vm48_vm1 = vcmp.lt.f32.partialorder %v24_v1, 1.0  ;;  %s100_s21 = scalar_lea.vmem %s59_s20, 256  ;;  %p105_p9 = scmp.lt.s32.totalorder %s59_s20, %s59_s20 }
  0x16   :  { %v27_v6 = vmul.f32 %v25_v2, %v25_v2  ;;  %v33_v7 = vadd.f32 48.0, %v31_v3  ;;  %v28_v8 = vmul.f32 %v26_v4, %v26_v4  ;;  %p101_p8 = scmp.ne.s32.totalorder %s59_s20, %s100_s21  ;;  %p106_p10 = scmp.lt.s32.totalorder %s100_s21, %s100_s21 }
  0x17   :  { %v34_v9 = vadd.f32 48.0, %v32_v5 }
  0x18   :  { %v29_v10 = vmul.f32 %v27_v6, %v23_v0  ;;  %v35_v11 = vmul.f32 %v33_v7, %v23_v0  ;;  %v30_v12 = vmul.f32 %v28_v8, %v24_v1  ;;  %p107_p11 = por %p106_p10, %p105_p9 }
  0x19   :  { %v36_v13 = vmul.f32 %v34_v9, %v24_v1 }
  0x1a   :  { %v37_v14 = vadd.f32 -28.0, %v35_v11  ;;  %p108_p12 = pnand %p107_p11, %p101_p8 }
  0x1b   :  { %v38_v15 = vadd.f32 -28.0, %v36_v13 }
  0x1c   :  { %v39_v16 = vmul.f32 %v37_v14, %v29_v10 }
  0x1d   :  { %v40_v17 = vmul.f32 %v38_v15, %v30_v12 }
  0x1e   :  { %v75_v18 = vpop.eup %74 }
  0x1f   :  { %v77_v19 = vpop.eup %76  ;;  %v45_v20 = vadd.f32 %v75_v18, %v39_v16 }
  0x20   :  { %v46_v21 = vadd.f32 %v77_v19, %v40_v17 }
  0x21   :  { %v49_v22 = vsel %vm47_vm0, %v45_v20, 0.0 }
  0x22   :  { %51 = vst [vmem:[#allocation5] sm:$0xff] %v49_v22  ;;  %v50_v23 = vsel %vm48_vm1, %v46_v21, 0.0 }
  0x23   :  { %52 = vst [vmem:[#allocation5 + $0x8] sm:$0xff] %v50_v23 }
  0x24   :  { %111 = shalt.err (!%p108_p12)
}
  0x25   :  { %s112_s24 = scalar_lea.hbm %s171_s1, 256 }
  0x26   :  { %p113_p13 = scmp.ne.s32.totalorder %s171_s1, %s112_s24  ;;  %p116_p0 = scmp.lt.u32.totalorder %s112_s24, %s171_s1 }
  0x28   :  { %p118_p1 = pnand %p116_p0, %p113_p13 }
  0x2a   :  { %121 = shalt.err (!%p118_p1)
}
  0x2b   :  { %64 = dma.vmem_to_hbm [thread:$0]  %s59_s20, 256, %s171_s1, [#allocation4], %s127_s16, %s127_s16, %s128_s17  }
  0x2c   :  { %124 = dma.done.wait [#allocation4], 256  }
  0x2d   :  { %125 = vsyncadd [#allocation4], 4294967040 }
  0x2e   :  { %68 = vsyncpa [#allocation3], 1 }
  0x2f   :  { %69 = vsyncpa [#allocation4], 1 }

</bundles_post_ra>
